<compile_context>
chip_gen: v7x
topology: tpu7x:2x2x1
jax: 0.10.0
libtpu: 0.0.40
codegen_flags: <defaults>
</compile_context>

<pallas_src>
import functools

import jax
import jax.numpy as jnp
from jax.experimental import pallas as pl
from jax.experimental.pallas import tpu as pltpu


def _round_up(x, m):
    return ((x + m - 1) // m) * m


def _cdiv(a, b):
    return (a + b - 1) // b


def _dnoise_loss_kernel(logits_ref, side_ref, cw_ref, loss_ref, wsum_ref, *,
                        n_rows, tile_n, ragged):
    x = logits_ref[...]                                # [TN, C] native dtype
    side = side_ref[...]                               # [TN, 3] f32: cw_y|x_y|bw
    cw = cw_ref[...].astype(jnp.float32)               # [1, C]

    tn, c = x.shape
    col = jax.lax.broadcasted_iota(jnp.int32, (tn, c), 1)

    # Row max and first-occurrence argmax on the native dtype (bit-exact;
    # keeps bf16 inputs on the cheap bf16 VALU/XLU path on v6e/v7x).
    row_max = jnp.max(x, axis=-1, keepdims=True)                       # [TN,1]
    amax_idx = jnp.min(jnp.where(x == row_max, col, c),
                       axis=-1, keepdims=True)                         # [TN,1]
    cw_z = jnp.sum(jnp.where(col == amax_idx, cw, 0.0),
                   axis=-1, keepdims=True)             # class_weight[argmax]

    # log-sum-exp in f32 (only full-tile f32 pass in the kernel).
    m = row_max.astype(jnp.float32)
    lse = jnp.log(jnp.sum(jnp.exp(x.astype(jnp.float32) - m),
                          axis=-1, keepdims=True))                     # [TN,1]

    cw_y = side[:, 0:1]                                # class_weight[target]
    x_y = side[:, 1:2]                                 # logits[i, target] (f32)
    bw = side[:, 2:3]                                  # per-sample batch weight

    # loss_i = -[(1-bw)*cw_y*log_sm[target] + bw*cw_z*log_sm[argmax]]
    #   with log_sm[target] = x_y - m - lse and log_sm[argmax] = -lse.
    row_loss = -(1.0 - bw) * cw_y * (x_y - m - lse) + bw * cw_z * lse
    row_w = cw_y                                       # sum(y*class_weight) term

    if ragged:  # cheap [TN,1] select for padded rows of the trailing block
        row = jax.lax.broadcasted_iota(jnp.int32, (tn, 1), 0)
        valid = (pl.program_id(0) * tile_n + row) < n_rows
        row_loss = jnp.where(valid, row_loss, 0.0)
        row_w = jnp.where(valid, row_w, 0.0)

    sum_loss = jnp.sum(row_loss, axis=0, keepdims=True)   # [1,1] block partial
    sum_w = jnp.sum(row_w, axis=0, keepdims=True)
    loss_ref[...] = jnp.broadcast_to(sum_loss.reshape(1, 1, 1), loss_ref.shape)
    wsum_ref[...] = jnp.broadcast_to(sum_w.reshape(1, 1, 1), wsum_ref.shape)


def dnoise_loss(net_output, targets, class_weight, batch_weights=0.5,
                reduction="mean", tile_n_max=2048):
    """DNoiseLoss core compute.

    batch_weights: scalar (epoch == 1 path uses 0.5) or per-sample array of
      shape [N] / [N, 1] (epoch != 1 path with host-computed BMM weights).
    """
    assert reduction in ("mean", "sum")
    n, c = net_output.shape

    in_bytes = jnp.dtype(net_output.dtype).itemsize
    sub = {4: 8, 2: 16, 1: 32}.get(in_bytes, 8)        # native sublane multiple

    # Tile sizing: double-buffered native-dtype logits + ~4 live f32 [TN,C]
    # temporaries must fit a conservative cross-generation VMEM budget
    # (v7x has only 64 MiB physical VMEM per TensorCore).
    budget = 24 * 1024 * 1024
    per_row = 2 * c * in_bytes + 4 * c * 4
    cap = max(sub, min(tile_n_max, (budget // per_row) // sub * sub))
    # Keep >= ~4 grid blocks when the batch allows it (megacore on v7x).
    tn = min(cap, max(sub, _round_up(_cdiv(n, 4), sub)))
    if tn >= n:
        tn = n                     # single block; block dim == full dim (legal)
    grid = _cdiv(n, tn)
    ragged = (n % tn) != 0

    # Tiny wrapper-side gathers, streamed as one (TN, 3) f32 slab.
    tgt = targets.reshape(n).astype(jnp.int32)
    cw_full = jnp.asarray(class_weight, jnp.float32).reshape(c)
    cw_y = cw_full[tgt]
    x_y = jnp.take_along_axis(net_output, tgt[:, None], axis=1)[:, 0]
    x_y = x_y.astype(jnp.float32)
    bw = jnp.asarray(batch_weights, jnp.float32)
    if bw.ndim == 0:
        bw = jnp.broadcast_to(bw, (n,))
    else:
        bw = bw.reshape(n)
    side = jnp.stack([cw_y, x_y, bw], axis=1)          # [N, 3] f32
    cw2 = cw_full.reshape(1, c)

    kernel = functools.partial(_dnoise_loss_kernel, n_rows=n, tile_n=tn,
                               ragged=ragged)

    cost = pl.CostEstimate(
        flops=8 * n * c,
        transcendentals=n * c,
        bytes_accessed=n * c * in_bytes + n * 3 * 4 + c * 4
                       + 2 * grid * 128 * 4)

    loss_p, wsum_p = pl.pallas_call(
        kernel,
        grid=(grid,),
        in_specs=[
            pl.BlockSpec((tn, c), lambda i: (i, 0)),   # logits (streamed, no pad)
            pl.BlockSpec((tn, 3), lambda i: (i, 0)),   # cw_y | x_y | bw slab
            pl.BlockSpec((1, c), lambda i: (0, 0)),    # resident class weights
        ],
        out_specs=(pl.BlockSpec((1, 1, 128), lambda i: (i, 0, 0)),
                   pl.BlockSpec((1, 1, 128), lambda i: (i, 0, 0))),
        out_shape=(jax.ShapeDtypeStruct((grid, 1, 128), jnp.float32),
                   jax.ShapeDtypeStruct((grid, 1, 128), jnp.float32)),
        compiler_params=pltpu.CompilerParams(
            dimension_semantics=("parallel",),
            vmem_limit_bytes=48 * 1024 * 1024),
        cost_estimate=cost,
    )(net_output, side, cw2)

    sum_loss = jnp.sum(loss_p[:, 0, 0])
    if reduction == "mean":
        return sum_loss / jnp.sum(wsum_p[:, 0, 0])
    return sum_loss


def dnoise_loss_forward(net_output, targets, class_weight, epoch,
                        batch_weights=None, reduction="mean"):
    """Mirrors DNoiseLoss.forward."""
    if epoch == 1:
        return dnoise_loss(net_output, targets, class_weight, 0.5, reduction)
    if batch_weights is None:
        # TODO(synk): epoch != 1 requires the host-side BetaMixture1D fit and
        # lookup (numpy/scipy) to produce per-sample weights; not a Pallas op.
        raise NotImplementedError(
            "epoch != 1 requires BetaMixture1D-derived batch_weights")
    return dnoise_loss(net_output, targets, class_weight, batch_weights,
                       reduction)


def _reference(net_output, targets, class_weight, batch_weights,
               reduction="mean"):
    """Pure-JAX reference (mirrors the PyTorch forward)."""
    n, c = net_output.shape
    cw = jnp.asarray(class_weight, jnp.float32).reshape(1, c)
    bw = jnp.asarray(batch_weights, jnp.float32).reshape(n, 1)
    y = jax.nn.one_hot(targets, c, dtype=jnp.float32)
    z = jax.nn.one_hot(jnp.argmax(net_output, axis=-1), c, dtype=jnp.float32)
    wt = (1.0 - bw) * y + bw * z
    log_sm = jax.nn.log_softmax(net_output.astype(jnp.float32), axis=-1)
    batch_loss = -jnp.sum(wt * log_sm * cw, axis=-1)
    if reduction == "mean":
        return jnp.sum(batch_loss) / jnp.sum(y * cw)
    return jnp.sum(batch_loss)


if __name__ == "__main__":
    N, C = 8, 32   # small classification head: 8 samples, 32 classes

    key = jax.random.PRNGKey(0)
    k1, k2, k3, k4 = jax.random.split(key, 4)
    net_output = jax.random.normal(k1, (N, C), dtype=jnp.float32)
    targets = jax.random.randint(k2, (N,), 0, C, dtype=jnp.int32)
    class_weight = jnp.linspace(0.5, 1.5, C, dtype=jnp.float32)

    # epoch == 1 path (constant batch weight 0.5), mean and sum reductions
    loss_mean = dnoise_loss_forward(net_output, targets, class_weight,
                                    epoch=1, reduction="mean")
    loss_sum = dnoise_loss_forward(net_output, targets, class_weight,
                                   epoch=1, reduction="sum")

    # per-sample batch-weight path, multi-block grid (tile_n_max=8 -> 3 blocks)
    N2 = 24
    net2 = jax.random.normal(k3, (N2, C), dtype=jnp.float32)
    tgt2 = jax.random.randint(k2, (N2,), 0, C, dtype=jnp.int32)
    bw2 = jnp.linspace(0.1, 0.9, N2, dtype=jnp.float32)
    loss2 = dnoise_loss(net2, tgt2, class_weight, bw2, reduction="mean",
                        tile_n_max=8)

    # ragged trailing block (20 % 8 != 0) + bf16 logits path
    N3 = 20
    net3 = jax.random.normal(k4, (N3, C), dtype=jnp.float32).astype(jnp.bfloat16)
    tgt3 = jax.random.randint(k2, (N3,), 0, C, dtype=jnp.int32)
    loss3 = dnoise_loss(net3, tgt3, class_weight, 0.5, reduction="mean",
                        tile_n_max=8)

    jax.block_until_ready((loss_mean, loss_sum, loss2, loss3))

    ref_mean = _reference(net_output, targets, class_weight,
                          0.5 * jnp.ones((N, 1), jnp.float32), "mean")
    ref_sum = _reference(net_output, targets, class_weight,
                         0.5 * jnp.ones((N, 1), jnp.float32), "sum")
    ref2 = _reference(net2, tgt2, class_weight, bw2.reshape(-1, 1), "mean")
    ref3 = _reference(net3, tgt3, class_weight,
                      0.5 * jnp.ones((N3, 1), jnp.float32), "mean")
    assert jnp.allclose(loss_mean, ref_mean, rtol=1e-5, atol=1e-5)
    assert jnp.allclose(loss_sum, ref_sum, rtol=1e-5, atol=1e-5)
    assert jnp.allclose(loss2, ref2, rtol=1e-5, atol=1e-5)
    assert jnp.allclose(loss3, ref3, rtol=1e-4, atol=1e-4)

    print("KERNEL_OK")
</pallas_src>

<mosaic_0001>
module attributes {stable_mosaic.version = 11 : i64} {
  func.func @_dnoise_loss_kernel(%arg0: i32, %arg1: memref<8x32xf32, #tpu.memory_space<vmem>>, %arg2: memref<8x3xf32, #tpu.memory_space<vmem>>, %arg3: memref<1x32xf32, #tpu.memory_space<vmem>>, %arg4: memref<1x1x128xf32, #tpu.memory_space<vmem>>, %arg5: memref<1x1x128xf32, #tpu.memory_space<vmem>>) attributes {dimension_semantics = [#tpu.dimension_semantics<parallel>], iteration_bounds = array<i64: 1>, scalar_prefetch = 0 : i64, scratch_operands = 0 : i64, tpu.core_type = #tpu.core_type<tc>, window_params = [{transform_indices = @transform_0, window_bounds = array<i64: 8, 32>}, {transform_indices = @transform_1, window_bounds = array<i64: 8, 3>}, {pipeline_mode = #tpu.pipeline_mode<synchronous>, transform_indices = @transform_2, window_bounds = array<i64: 1, 32>}, {transform_indices = @transform_3, window_bounds = array<i64: 1, 1, 128>}, {transform_indices = @transform_4, window_bounds = array<i64: 1, 1, 128>}]} {
    %c0 = arith.constant 0 : index
    %c0_0 = arith.constant 0 : index
    %0 = vector.load %arg1[%c0, %c0_0] : memref<8x32xf32, #tpu.memory_space<vmem>>, vector<8x32xf32>
    %c0_1 = arith.constant 0 : index
    %c0_2 = arith.constant 0 : index
    %1 = vector.load %arg2[%c0_1, %c0_2] : memref<8x3xf32, #tpu.memory_space<vmem>>, vector<8x3xf32>
    %c0_3 = arith.constant 0 : index
    %c0_4 = arith.constant 0 : index
    %2 = vector.load %arg3[%c0_3, %c0_4] : memref<1x32xf32, #tpu.memory_space<vmem>>, vector<1x32xf32>
    %3 = tpu.iota {dimensions = array<i32: 1>} : vector<8x32xi32>
    %cst = arith.constant dense<0xFF800000> : vector<8xf32>
    %4 = vector.multi_reduction <maximumf>, %0, %cst [1] : vector<8x32xf32> to vector<8xf32>
    %5 = vector.shape_cast %4 : vector<8xf32> to vector<8x1xf32>
    %6 = vector.broadcast %5 : vector<8x1xf32> to vector<8x32xf32>
    %7 = arith.cmpf oeq, %0, %6 : vector<8x32xf32>
    %c32_i32 = arith.constant 32 : i32
    %8 = vector.broadcast %c32_i32 : i32 to vector<8x32xi32>
    %9 = arith.select %7, %3, %8 : vector<8x32xi1>, vector<8x32xi32>
    %cst_5 = arith.constant dense<2147483647> : vector<8xi32>
    %10 = vector.multi_reduction <minsi>, %9, %cst_5 [1] : vector<8x32xi32> to vector<8xi32>
    %11 = vector.shape_cast %10 : vector<8xi32> to vector<8x1xi32>
    %12 = vector.broadcast %11 : vector<8x1xi32> to vector<8x32xi32>
    %13 = arith.cmpi eq, %3, %12 : vector<8x32xi32>
    %cst_6 = arith.constant 0.000000e+00 : f32
    %14 = vector.shape_cast %2 : vector<1x32xf32> to vector<1x32xf32>
    %15 = vector.broadcast %14 : vector<1x32xf32> to vector<8x32xf32>
    %16 = vector.broadcast %cst_6 : f32 to vector<8x32xf32>
    %17 = arith.select %13, %15, %16 : vector<8x32xi1>, vector<8x32xf32>
    %cst_7 = arith.constant dense<0.000000e+00> : vector<8xf32>
    %18 = vector.multi_reduction <add>, %17, %cst_7 [1] : vector<8x32xf32> to vector<8xf32>
    %19 = vector.shape_cast %18 : vector<8xf32> to vector<8x1xf32>
    %20 = vector.broadcast %5 : vector<8x1xf32> to vector<8x32xf32>
    %21 = arith.subf %0, %20 : vector<8x32xf32>
    %22 = math.exp %21 : vector<8x32xf32>
    %cst_8 = arith.constant dense<0.000000e+00> : vector<8xf32>
    %23 = vector.multi_reduction <add>, %22, %cst_8 [1] : vector<8x32xf32> to vector<8xf32>
    %24 = vector.shape_cast %23 : vector<8xf32> to vector<8x1xf32>
    %25 = math.log %24 : vector<8x1xf32>
    %26 = vector.extract_strided_slice %1 {offsets = [0, 0], sizes = [8, 1], strides = [1, 1]} : vector<8x3xf32> to vector<8x1xf32>
    %27 = vector.extract_strided_slice %1 {offsets = [0, 1], sizes = [8, 1], strides = [1, 1]} : vector<8x3xf32> to vector<8x1xf32>
    %28 = vector.extract_strided_slice %1 {offsets = [0, 2], sizes = [8, 1], strides = [1, 1]} : vector<8x3xf32> to vector<8x1xf32>
    %cst_9 = arith.constant 1.000000e+00 : f32
    %29 = vector.broadcast %cst_9 : f32 to vector<8x1xf32>
    %30 = arith.subf %29, %28 : vector<8x1xf32>
    %cst_10 = arith.constant 0.000000e+00 : f32
    %31 = vector.broadcast %cst_10 : f32 to vector<8x1xf32>
    %32 = arith.subf %31, %30 : vector<8x1xf32>
    %33 = arith.mulf %32, %26 : vector<8x1xf32>
    %34 = arith.subf %27, %5 : vector<8x1xf32>
    %35 = arith.subf %34, %25 : vector<8x1xf32>
    %36 = arith.mulf %33, %35 : vector<8x1xf32>
    %37 = arith.mulf %28, %19 : vector<8x1xf32>
    %38 = arith.mulf %37, %25 : vector<8x1xf32>
    %39 = arith.addf %36, %38 : vector<8x1xf32>
    %cst_11 = arith.constant dense<0.000000e+00> : vector<1xf32>
    %40 = vector.multi_reduction <add>, %39, %cst_11 [0] : vector<8x1xf32> to vector<1xf32>
    %41 = vector.shape_cast %40 : vector<1xf32> to vector<1x1xf32>
    %cst_12 = arith.constant dense<0.000000e+00> : vector<1xf32>
    %42 = vector.multi_reduction <add>, %26, %cst_12 [0] : vector<8x1xf32> to vector<1xf32>
    %43 = vector.shape_cast %42 : vector<1xf32> to vector<1x1xf32>
    %44 = vector.shape_cast %41 : vector<1x1xf32> to vector<1x1x1xf32>
    %45 = vector.shape_cast %44 : vector<1x1x1xf32> to vector<1x1x1xf32>
    %46 = vector.broadcast %45 : vector<1x1x1xf32> to vector<1x1x128xf32>
    %c0_13 = arith.constant 0 : index
    %c0_14 = arith.constant 0 : index
    %c0_15 = arith.constant 0 : index
    %47 = vector.load %arg4[%c0_13, %c0_14, %c0_15] : memref<1x1x128xf32, #tpu.memory_space<vmem>>, vector<1x1x128xf32>
    tpu.vector_store %arg4[%c0_13, %c0_14, %c0_15], %46 {strides = array<i32>} : memref<1x1x128xf32, #tpu.memory_space<vmem>>, vector<1x1x128xf32>,
    %48 = vector.shape_cast %43 : vector<1x1xf32> to vector<1x1x1xf32>
    %49 = vector.shape_cast %48 : vector<1x1x1xf32> to vector<1x1x1xf32>
    %50 = vector.broadcast %49 : vector<1x1x1xf32> to vector<1x1x128xf32>
    %c0_16 = arith.constant 0 : index
    %c0_17 = arith.constant 0 : index
    %c0_18 = arith.constant 0 : index
    %51 = vector.load %arg5[%c0_16, %c0_17, %c0_18] : memref<1x1x128xf32, #tpu.memory_space<vmem>>, vector<1x1x128xf32>
    tpu.vector_store %arg5[%c0_16, %c0_17, %c0_18], %50 {strides = array<i32>} : memref<1x1x128xf32, #tpu.memory_space<vmem>>, vector<1x1x128xf32>,
    return
  }
  func.func @transform_0(%arg0: i32) -> (i32, i32) {
    %c0_i32 = arith.constant 0 : i32
    %c0_i32_0 = arith.constant 0 : i32
    return %arg0, %c0_i32 : i32, i32
  }
  func.func @transform_1(%arg0: i32) -> (i32, i32) {
    %c0_i32 = arith.constant 0 : i32
    %c0_i32_0 = arith.constant 0 : i32
    return %arg0, %c0_i32 : i32, i32
  }
  func.func @transform_2(%arg0: i32) -> (i32, i32) {
    %c0_i32 = arith.constant 0 : i32
    %c0_i32_0 = arith.constant 0 : i32
    %c0_i32_1 = arith.constant 0 : i32
    return %c0_i32, %c0_i32_0 : i32, i32
  }
  func.func @transform_3(%arg0: i32) -> (i32, i32, i32) {
    %c0_i32 = arith.constant 0 : i32
    %c0_i32_0 = arith.constant 0 : i32
    %c0_i32_1 = arith.constant 0 : i32
    return %arg0, %c0_i32, %c0_i32_0 : i32, i32, i32
  }
  func.func @transform_4(%arg0: i32) -> (i32, i32, i32) {
    %c0_i32 = arith.constant 0 : i32
    %c0_i32_0 = arith.constant 0 : i32
    %c0_i32_1 = arith.constant 0 : i32
    return %arg0, %c0_i32, %c0_i32_0 : i32, i32, i32
  }
}

</mosaic_0001>

<bundles_post_ra>
// kernel: tpu_custom_call.1
= control target key start
LH: loop header
LB: loop body
LE: loop exit
PB: predicated region body
PF: predicated region fallthrough
CT: control target
= control target key end

     0   :  { %10 = vsyncpa [#allocation3], 0  ;;  %vm23_vm0 = vcmask 261120   ;;  %s266_s0 = inlined_call_operand.vmem [shape: f32[8,32], index: 0, kind: input, shape index: {}]   ;;  %s267_s1 = inlined_call_operand.vmem [shape: f32[8,3], index: 1, kind: input, shape index: {}]   ;;  %s268_s2 = inlined_call_operand.vmem [shape: f32[1,32], index: 2, kind: input, shape index: {}]   ;;  %s269_s3 = inlined_call_operand.hbm [shape: f32[1,1,128], index: 3, kind: output, shape index: {0}]   ;;  %s270_s4 = inlined_call_operand.hbm [shape: f32[1,1,128], index: 4, kind: output, shape index: {1}]  }
   0x1   :  { %v18_v0 = vld [vmem:[%s266_s0] sm:$0xff] }
   0x2   :  { %11 = vsyncpa [#allocation5], 0  ;;  %v24_v1 = vsel %vm23_vm0, %v18_v0, -inf  ;;  %v21_v2 = vlaneseq  ;;  %v19_v17 = vld [vmem:[%s267_s1] sm:$0xff]  ;;  %s198_s18 = smov 2   ;;  %s199_s1 = smov 1  }
   0x3   :  { %25 = vmax.xlane.f32.xlu0 %v24_v1  ;;  %v136_v23 = vld [vmem:[%s268_s2] ss:$0 sm:$0xff]  ;;  %v200_v31 = vmov 2   ;;  %v201_v32 = vmov 0   ;;  %v63_v33 = vsub.f32 1.0, %v19_v17  ;;  %vm88_vm4 = vcmask 7168  }
   0x4   :  { %v22_v3 = vand.u32 127, %v21_v2  ;;  %143 = vset.pattern.permute.xlu1 %v200_v31  ;;  %145 = vset.pattern.permute.xlu0 %v201_v32  ;;  %v89_v37 = vsel %vm88_vm4, %v19_v17, 0.0  ;;  %vm80_vm5 = vcmask 23568   ;;  %s202_s2 = smov [#allocation2]   ;;  %s203_s22 = smov [#allocation4]  }
   0x5   :  { %v64_v34 = vsub.f32 0.0, %v63_v33  ;;  %v90_v40 = vrot.slane %v89_v37, 4  ;;  %s114_s21 = sshll.u32 %s202_s2, 4  ;;  %s124_s23 = sshll.u32 %s203_s22, 4  ;;  %s115_s21 = int_to_ptr.vmem [resolvable:$true] %s114_s21  ;;  %s125_s23 = int_to_ptr.vmem [resolvable:$true] %s124_s23 }
   0x6   :  { %s150_s24 = scalar_lea.vmem %s115_s21, 16  ;;  %s154_s25 = scalar_lea.vmem %s115_s21, 32 }
   0x7   :  { %v91_v45 = vadd.f32 %v90_v40, %v89_v37  ;;  %p151_p0 = scmp.ne.s32.totalorder %s115_s21, %s150_s24  ;;  %p155_p1 = scmp.lt.s32.totalorder %s115_s21, %s115_s21 }
   0x8   :  { %p156_p2 = scmp.lt.s32.totalorder %s154_s25, %s150_s24 }
   0x9   :  { %v92_v48 = vrot.slane %v91_v45, 2 }
   0xa   :  { %p157_p3 = por %p156_p2, %p155_p1 }
   0xb   :  { %v93_v51 = vadd.f32 %v92_v48, %v91_v45 }
   0xc   :  { %p158_p4 = pnand %p157_p3, %p151_p0 }
   0xd   :  { %v94_v54 = vrot.slane %v93_v51, 1 }
   0xf   :  { %v95_v56 = vadd.f32 %v94_v54, %v93_v51 }
  0x90   :  { %v26_v4 = vpop.xlane.xlu0 %25 }
  0x91   :  { %vm27_vm1 = vcmp.eq.f32.partialorder %v18_v0, %v26_v4  ;;  %v55_v9 = vsub.f32 %v18_v0, %v26_v4  ;;  %v70_v29 = vsub.f32 %v19_v17, %v26_v4 }
  0x92   :  { %v28_v5 = vsel %vm27_vm1, %v22_v3, 32 }
  0x93   :  { %v29_v6 = vsel %vm23_vm0, %v28_v5, 2147483647  ;;  %v56_v10 = vmul.f32 1.442695, %v55_v9 }
  0x94   :  { %v31_v7 = vshra.s32 %v29_v6, 16  ;;  %v30_v11 = vand.u32 65535, %v29_v6 }
  0x95   :  { %146 = vpow2.f32 %v56_v10 }
  0x96   :  { %v33_v8 = vcvt.s32.f32 %v31_v7  ;;  %v32_v13 = vcvt.s32.f32 %v30_v11 }
  0x98   :  { %34 = vmin.xlane.f32.xlu0 %v33_v8 }
  0x9f   :  { %v147_v15 = vpop.eup %146 }
  0xa0   :  { %v58_v16 = vsel %vm23_vm0, %v147_v15, 0.0 }
 0x125   :  { %v35_v12 = vpop.xlane.xlu0 %34 }
 0x126   :  { %vm36_vm2 = vcmp.eq.f32.partialorder %v33_v8, %v35_v12  ;;  %v41_v18 = vcvt.f32.s32 %v35_v12 }
 0x127   :  { %v37_v14 = vsel %vm36_vm2, %v32_v13, inf }
 0x128   :  { %38 = vmin.xlane.f32.xlu1 %v37_v14  ;;  %v42_v20 = vshll.u32 %v41_v18, 16 }
 0x12c   :  { %59 = vadd.xlane.f32.xlu1 %v58_v16 }
 0x13d   :  { %66 = vrot.lane.b32.xlu1 %v19_v17, %s198_s18 }
 0x1b5   :  { %v39_v19 = vpop.xlane.xlu1 %38 }
 0x1b6   :  { %v40_v21 = vcvt.f32.s32 %v39_v19 }
 0x1b8   :  { %v43_v22 = vadd.s32 %v42_v20, %v40_v21 }
 0x1b9   :  { %v60_v26 = vpop.xlane.xlu1 %59 }
 0x1ba   :  { %vm44_vm3 = vcmp.eq.s32.totalorder %v22_v3, %v43_v22  ;;  %148 = vlog2.f32 %v60_v26 }
 0x1bb   :  { %v51_v24 = vsel %vm44_vm3, %v136_v23, 0.0 }
 0x1bc   :  { %v52_v25 = vsel %vm23_vm0, %v51_v24, 0.0 }
 0x1bd   :  { %53 = vadd.xlane.f32.xlu0 %v52_v25  ;;  %v67_v35 = vpop.permute.xlu1 %66 }
 0x1be   :  { %v69_v39 = vmul.f32 %v67_v35, %v64_v34 }
 0x1c4   :  { %v149_v27 = vpop.eup %148 }
 0x1c5   :  { %v62_v28 = vmul.f32 0.6931472, %v149_v27 }
 0x1c7   :  { %v71_v30 = vsub.f32 %v70_v29, %v62_v28 }
 0x1d3   :  { %73 = vrot.lane.b32.xlu0 %v71_v30, %s199_s1 }
 0x24a   :  { %v54_v36 = vpop.xlane.xlu0 %53 }
 0x24b   :  { %v77_v38 = vmul.f32 %v54_v36, %v19_v17 }
 0x24d   :  { %v78_v42 = vmul.f32 %v77_v38, %v62_v28 }
 0x24e   :  { %v74_v41 = vpop.permute.xlu0 %73 }
 0x24f   :  { %v76_v43 = vmul.f32 %v74_v41, %v69_v39 }
 0x251   :  { %v79_v44 = vadd.f32 %v78_v42, %v76_v43 }
 0x253   :  { %v81_v46 = vsel %vm80_vm5, %v79_v44, 0.0 }
 0x254   :  { %v82_v47 = vrot.slane %v81_v46, 4 }
 0x256   :  { %v83_v49 = vadd.f32 %v82_v47, %v81_v46 }
 0x258   :  { %v84_v50 = vrot.slane %v83_v49, 2 }
 0x25a   :  { %v85_v52 = vadd.f32 %v84_v50, %v83_v49 }
 0x25c   :  { %v86_v53 = vrot.slane %v85_v52, 1 }
 0x25e   :  { %v87_v55 = vadd.f32 %v86_v53, %v85_v52 }
 0x260   :  { %98 = vperm.xlu1 %143, %v87_v55  }
 0x264   :  { %144 = vset.pattern.permute.xlu1 %v201_v32 }
 0x265   :  { %104 = vperm.xlu1 %144, %v95_v56  }
 0x2df   :  { %v99_v57 = vpop.permute.xlu1 %98 }
 0x2e0   :  { %101 = vst [vmem:[#allocation2] sm:$0x1] %v99_v57 }
 0x2e1   :  { %161 = shalt.err (!%p158_p4)
}
 0x2e2   :  { %s162_s28 = scalar_lea.hbm %s269_s3, 16 }
 0x2e3   :  { %p163_p5 = scmp.ne.s32.totalorder %s269_s3, %s162_s28  ;;  %p166_p6 = scmp.lt.u32.totalorder %s162_s28, %s269_s3 }
 0x2e5   :  { %p168_p7 = pnand %p166_p6, %p163_p5 }
 0x2e7   :  { %171 = shalt.err (!%p168_p7)
}
 0x2e8   :  { %117 = dma.vmem_to_hbm [thread:$0]  %s115_s21, 16, %s269_s3, [#allocation3]   ;;  %v105_v58 = vpop.permute.xlu1 %104 }
 0x2e9   :  { %107 = vst [vmem:[#allocation4] sm:$0x1] %v105_v58  ;;  %s172_s9 = scalar_lea.vmem %s125_s23, 16  ;;  %s176_s10 = scalar_lea.vmem %s125_s23, 32 }
 0x2ea   :  { %p173_p8 = scmp.ne.s32.totalorder %s125_s23, %s172_s9  ;;  %p177_p9 = scmp.lt.s32.totalorder %s125_s23, %s125_s23 }
 0x2eb   :  { %p178_p10 = scmp.lt.s32.totalorder %s176_s10, %s172_s9 }
 0x2ed   :  { %p179_p11 = por %p178_p10, %p177_p9 }
 0x2ef   :  { %p180_p12 = pnand %p179_p11, %p173_p8 }
 0x2f1   :  { %183 = shalt.err (!%p180_p12)
}
 0x2f2   :  { %s184_s13 = scalar_lea.hbm %s270_s4, 16 }
 0x2f3   :  { %p185_p13 = scmp.ne.s32.totalorder %s270_s4, %s184_s13  ;;  %p188_p0 = scmp.lt.u32.totalorder %s184_s13, %s270_s4 }
 0x2f5   :  { %p190_p1 = pnand %p188_p0, %p185_p13 }
 0x2f7   :  { %193 = shalt.err (!%p190_p1)
}
 0x2f8   :  { %127 = dma.vmem_to_hbm [thread:$0]  %s125_s23, 16, %s270_s4, [#allocation5]  }
 0x2f9   :  { %194 = dma.done.wait [#allocation3], 16  }
 0x2fa   :  { %195 = vsyncadd [#allocation3], 4294967280 }
 0x2fb   :  { %196 = dma.done.wait [#allocation5], 16  }
 0x2fc   :  { %197 = vsyncadd [#allocation5], 4294967280 }
 0x2fd   :  { %134 = vsyncpa [#allocation3], 1 }
 0x2fe   :  { %135 = vsyncpa [#allocation5], 1 }

</bundles_post_ra>
